<compile_context>
chip_gen: v7x
topology: tpu7x:2x2x1
jax: 0.10.0
libtpu: 0.0.40
codegen_flags: <defaults>
</compile_context>

<pallas_src>
import functools

import jax
import jax.numpy as jnp
from jax.experimental import pallas as pl
from jax.experimental.pallas import tpu as pltpu


def _round_up(x: int, m: int) -> int:
    return ((x + m - 1) // m) * m


_NEG_LARGE = -1e30          # finite "-inf": exp underflows to 0, no nan risk
_TINY_WORK_THRESHOLD = 1 << 16   # B * H_pad below this -> plain XLA path
_SINGLE_BUFFER_WEIGHTS = hasattr(pl, "Buffered")   # pl.Buffered(1) availability


# ----------------------------- Pallas kernel --------------------------------
def categorical_net_kernel(x_ref, w0_ref, b0_ref, w1_ref, b1_ref, w2_ref, b2_ref,
                           out_ref):
    """Fused MLP (2 hidden ReLU layers) + final linear + log-softmax.

    x_ref:  [TB, D_pad]    (bf16)
    w0_ref: [D_pad, H_pad] (bf16),  b0_ref: [1, H_pad] (f32)
    w1_ref: [H_pad, H_pad] (bf16),  b1_ref: [1, H_pad] (f32)
    w2_ref: [H_pad, A_pad] (bf16),  b2_ref: [1, A_pad] (f32, -1e30 on pad cols)
    out_ref: [TB, A_pad]   (f32 or bf16)   normalized logits (log-probs)
    """
    x = x_ref[...]

    # hidden layer 0 (MXU bf16 -> f32 accumulate, elementwise in f32)
    h = jnp.dot(x, w0_ref[...], preferred_element_type=jnp.float32) + b0_ref[...]
    h = jnp.maximum(h, 0.0)

    # hidden layer 1
    h = jnp.dot(h.astype(w1_ref.dtype), w1_ref[...],
                preferred_element_type=jnp.float32) + b1_ref[...]
    h = jnp.maximum(h, 0.0)

    # output (action logits); padded columns carry -1e30 bias
    logits = jnp.dot(h.astype(w2_ref.dtype), w2_ref[...],
                     preferred_element_type=jnp.float32) + b2_ref[...]

    # torch.distributions.Categorical normalization: logits - logsumexp(logits)
    m = jnp.max(logits, axis=-1, keepdims=True)
    shifted = logits - m
    lse = jnp.log(jnp.sum(jnp.exp(shifted), axis=-1, keepdims=True))
    out_ref[...] = (shifted - lse).astype(out_ref.dtype)


# --------------------------- one-time preparation -----------------------------
def prepare_params(params, compute_dtype=jnp.bfloat16):
    """One-time pad + cast of MLP weights to lane-dense, MXU-friendly shapes.

    Call once (after building / loading the module parameters) and reuse the
    result for every forward call: this hoists the weight padding + bf16 cast
    out of the per-call path (the single largest per-call cost previously).
    Returns ((w0p, b0p, w1p, b1p, w2p, b2p), (D, H, A)).
    """
    w0, b0, w1, b1, w2, b2 = params
    D, H = int(w0.shape[0]), int(w0.shape[1])
    A = int(w2.shape[1])
    cdt = jnp.dtype(compute_dtype)

    # 128-lane padding (zero rows/cols are exact no-ops through the matmuls;
    # padded logit columns get a -1e30 bias and are sliced off afterwards).
    # TODO(synk): for H,A >= 256 on v6e/v7x rounding to 256 fills the 2x256x256
    # MXU better; 128 kept here (optimal on v5e and for small dims).
    D_pad, H_pad, A_pad = (_round_up(d, 128) for d in (D, H, A))

    w0p = jnp.zeros((D_pad, H_pad), cdt).at[:D, :H].set(jnp.asarray(w0, cdt))
    w1p = jnp.zeros((H_pad, H_pad), cdt).at[:H, :H].set(jnp.asarray(w1, cdt))
    w2p = jnp.zeros((H_pad, A_pad), cdt).at[:H, :A].set(jnp.asarray(w2, cdt))
    b0p = jnp.zeros((1, H_pad), jnp.float32).at[:, :H].set(
        jnp.asarray(b0, jnp.float32).reshape(1, H))
    b1p = jnp.zeros((1, H_pad), jnp.float32).at[:, :H].set(
        jnp.asarray(b1, jnp.float32).reshape(1, H))
    b2p = jnp.full((1, A_pad), _NEG_LARGE, jnp.float32).at[:, :A].set(
        jnp.asarray(b2, jnp.float32).reshape(1, A))

    padded = jax.block_until_ready((w0p, b0p, w1p, b1p, w2p, b2p))
    return padded, (D, H, A)


def _vmem_capacity_bytes() -> int:
    """Physical VMEM of the current chip; conservative default if unknown."""
    try:
        return int(pltpu.get_tpu_info().vmem_capacity_bytes)
    except Exception:
        return 64 << 20   # v7x physical VMEM (safe lower bound for v5e/v6e)


# ------------------------------ forward paths ---------------------------------
@functools.partial(jax.jit, static_argnames=("dims", "out_dtype", "max_batch_tile",
                                             "single_buffer_weights"))
def _pallas_forward(x, w0p, b0p, w1p, b1p, w2p, b2p, *, dims, out_dtype,
                    max_batch_tile, single_buffer_weights):
    D, H, A = dims
    B = x.shape[0]
    cdt = w0p.dtype
    out_dt = jnp.dtype(out_dtype)
    D_pad, H_pad = w0p.shape
    A_pad = w2p.shape[1]

    # Batch tiling: bounded padding (<16 rows per tile), 16-row bf16 sublane
    # pack, and >=2 grid steps whenever B > max_batch_tile (keeps both v7x
    # TensorCores busy and lets the x/out double-buffer overlap).
    n_tiles = pl.cdiv(B, max_batch_tile)
    TB = _round_up(pl.cdiv(B, n_tiles), 16)
    B_pad = n_tiles * TB

    # Only materialize a padded copy of x when actually needed.
    if B == B_pad and D == D_pad:
        xp = x.astype(cdt)
    else:
        xp = jnp.zeros((B_pad, D_pad), cdt).at[:B, :D].set(x.astype(cdt))

    # advisory cost estimate for XLA scheduling
    flops = 2 * B_pad * (D_pad * H_pad + H_pad * H_pad + H_pad * A_pad)
    transcendentals = B_pad * (A_pad + 1)          # exp per logit + log per row
    bytes_accessed = (
        B_pad * D_pad * cdt.itemsize
        + (w0p.size + w1p.size + w2p.size) * cdt.itemsize
        + (b0p.size + b1p.size + b2p.size) * 4
        + B_pad * A_pad * out_dt.itemsize)

    # VMEM budget: double-buffered x/out tiles, weights resident (single- or
    # double-buffered depending on support), f32 intermediates.  Clamped to
    # ~90% of this generation's physical VMEM.
    weight_bufs = 1 if single_buffer_weights else 2
    vmem_bytes = (
        2 * TB * D_pad * cdt.itemsize
        + 2 * TB * A_pad * out_dt.itemsize
        + weight_bufs * (w0p.size + w1p.size + w2p.size) * cdt.itemsize
        + weight_bufs * (b0p.size + b1p.size + b2p.size) * 4
        + 4 * TB * max(H_pad, A_pad) * 4)
    vmem_limit = int(min(max(int(vmem_bytes * 1.25), 4 << 20),
                         int(_vmem_capacity_bytes() * 0.9)))

    def const_spec(shape):
        # Weights/biases use a constant index_map: fetched once, stay VMEM
        # resident.  Request a single buffer (instead of the default double
        # buffer) to halve their VMEM footprint when supported.
        if single_buffer_weights:
            return pl.BlockSpec(shape, lambda i: (0, 0),
                                pipeline_mode=pl.Buffered(1))
        return pl.BlockSpec(shape, lambda i: (0, 0))

    out_pad = pl.pallas_call(
        categorical_net_kernel,
        out_shape=jax.ShapeDtypeStruct((B_pad, A_pad), out_dt),
        grid=(n_tiles,),
        in_specs=[
            pl.BlockSpec((TB, D_pad), lambda i: (i, 0)),   # x: tiled over batch
            const_spec((D_pad, H_pad)),                    # w0
            const_spec((1, H_pad)),                        # b0
            const_spec((H_pad, H_pad)),                    # w1
            const_spec((1, H_pad)),                        # b1
            const_spec((H_pad, A_pad)),                    # w2
            const_spec((1, A_pad)),                        # b2
        ],
        out_specs=pl.BlockSpec((TB, A_pad), lambda i: (i, 0)),
        compiler_params=pltpu.CompilerParams(
            dimension_semantics=("parallel",),
            vmem_limit_bytes=vmem_limit),
        cost_estimate=pl.CostEstimate(
            flops=flops, transcendentals=transcendentals,
            bytes_accessed=bytes_accessed),
    )(xp, w0p, b0p, w1p, b1p, w2p, b2p)

    return out_pad[:B, :A]


@functools.partial(jax.jit, static_argnames=("dims", "out_dtype"))
def _xla_forward(x, w0p, b0p, w1p, b1p, w2p, b2p, *, dims, out_dtype):
    """Plain-XLA fallback for tiny shapes (same bf16/f32 math as the kernel)."""
    D, H, A = dims
    cdt = w0p.dtype
    h = jnp.dot(x.astype(cdt), w0p[:D, :H],
                preferred_element_type=jnp.float32) + b0p[:, :H]
    h = jnp.maximum(h, 0.0)
    h = jnp.dot(h.astype(cdt), w1p[:H, :H],
                preferred_element_type=jnp.float32) + b1p[:, :H]
    h = jnp.maximum(h, 0.0)
    logits = jnp.dot(h.astype(cdt), w2p[:H, :A],
                     preferred_element_type=jnp.float32) + b2p[:, :A]
    return jax.nn.log_softmax(logits, axis=-1).astype(jnp.dtype(out_dtype))


def categorical_net_forward(x, prepared, *, out_dtype=jnp.bfloat16,
                            max_batch_tile=256, use_pallas=None):
    """CategoricalNet.forward: returns normalized Categorical logits [B, A].

    `prepared` is the result of prepare_params(params) (padded + bf16-cast
    weights, computed once).  out_dtype defaults to bf16 (log-softmax math is
    always f32); pass jnp.float32 for full-precision output.
    """
    global _SINGLE_BUFFER_WEIGHTS
    padded, dims = prepared
    D, H, A = dims
    assert x.ndim == 2 and x.shape[1] == D, f"expected x [B, {D}], got {x.shape}"
    B = x.shape[0]
    H_pad = padded[0].shape[1]

    if use_pallas is None:
        # Tiny shapes: the wrapper pad/slice + per-call overhead dwarfs the
        # actual work; the plain-XLA path is strictly faster there.
        use_pallas = (B * H_pad) >= _TINY_WORK_THRESHOLD
    if not use_pallas:
        return _xla_forward(x, *padded, dims=dims, out_dtype=out_dtype)

    if _SINGLE_BUFFER_WEIGHTS:
        try:
            return _pallas_forward(x, *padded, dims=dims, out_dtype=out_dtype,
                                   max_batch_tile=max_batch_tile,
                                   single_buffer_weights=True)
        except Exception:
            # pl.Buffered(1) unsupported on this jax build: fall back to the
            # default double-buffered weight blocks (identical semantics).
            _SINGLE_BUFFER_WEIGHTS = False
    return _pallas_forward(x, *padded, dims=dims, out_dtype=out_dtype,
                           max_batch_tile=max_batch_tile,
                           single_buffer_weights=False)


# ------------------------- deterministic init --------------------------------
def orthogonal_init(key, in_dim, out_dim, gain=1.0):
    """Orthogonal init (mirrors nn.init.orthogonal_), stored as [in, out]."""
    n = max(in_dim, out_dim)
    a = jax.random.normal(key, (n, n), dtype=jnp.float32)
    q, _ = jnp.linalg.qr(a)
    return gain * q[:in_dim, :out_dim]


def make_params(key, input_dim, hidden_dim, action_dim, last_layer_gain=0.01):
    k0, k1, k2 = jax.random.split(key, 3)
    w0 = orthogonal_init(k0, input_dim, hidden_dim, gain=1.0)
    b0 = jnp.zeros((1, hidden_dim), jnp.float32)
    w1 = orthogonal_init(k1, hidden_dim, hidden_dim, gain=1.0)
    b1 = jnp.zeros((1, hidden_dim), jnp.float32)
    w2 = orthogonal_init(k2, hidden_dim, action_dim, gain=last_layer_gain)
    b2 = jnp.zeros((1, action_dim), jnp.float32)
    return (w0, b0, w1, b1, w2, b2)


# ----------------------------- references ------------------------------------
def reference_forward_f32(x, params):
    """Pure-f32 reference (module semantics)."""
    w0, b0, w1, b1, w2, b2 = params
    h = jnp.maximum(x @ w0 + b0, 0.0)
    h = jnp.maximum(h @ w1 + b1, 0.0)
    logits = h @ w2 + b2
    return jax.nn.log_softmax(logits, axis=-1)


def reference_forward_bf16(x, params):
    """Mirrors the kernel's bf16-matmul / f32-accumulate math."""
    w0, b0, w1, b1, w2, b2 = params
    c = jnp.bfloat16
    h = jnp.dot(x.astype(c), w0.astype(c), preferred_element_type=jnp.float32) + b0
    h = jnp.maximum(h, 0.0)
    h = jnp.dot(h.astype(c), w1.astype(c), preferred_element_type=jnp.float32) + b1
    h = jnp.maximum(h, 0.0)
    logits = jnp.dot(h.astype(c), w2.astype(c),
                     preferred_element_type=jnp.float32) + b2
    return jax.nn.log_softmax(logits, axis=-1)


if __name__ == "__main__":
    # CategoricalNet(input_dim=32, action_dim=8, hidden_dim=32, hidden_depth=2)
    B, D_IN, HID, A = 8, 32, 32, 8

    key = jax.random.PRNGKey(0)
    kx, kp = jax.random.split(key)
    x = jax.random.normal(kx, (B, D_IN), dtype=jnp.float32)
    params = make_params(kp, D_IN, HID, A, last_layer_gain=0.01)

    prepared = prepare_params(params)            # one-time pad + bf16 cast

    ref_bf16 = reference_forward_bf16(x, params)  # same math as the kernel
    ref_f32 = reference_forward_f32(x, params)    # module semantics

    # Force the Pallas path (the auto heuristic would route this tiny demo
    # shape to the plain-XLA fallback).
    logits = categorical_net_forward(x, prepared, out_dtype=jnp.float32,
                                     use_pallas=True)
    logits = jax.block_until_ready(logits)
    assert logits.shape == (B, A)
    assert jnp.allclose(logits, ref_bf16, atol=2e-3, rtol=2e-3), \
        "mismatch vs bf16 reference"
    assert jnp.allclose(logits, ref_f32, atol=5e-2, rtol=5e-2), \
        "mismatch vs f32 reference"

    # Default bf16-output path (padded -1e30 logit columns stay finite in bf16
    # and are sliced off regardless).
    logits_bf16 = jax.block_until_ready(
        categorical_net_forward(x, prepared, use_pallas=True))
    assert logits_bf16.shape == (B, A) and logits_bf16.dtype == jnp.bfloat16
    assert jnp.allclose(logits_bf16.astype(jnp.float32), ref_bf16,
                        atol=3e-2, rtol=3e-2), "mismatch on bf16 output"

    # Exercise the batch-padding path (B not a multiple of 16).
    x_odd = jax.random.normal(kx, (5, D_IN), dtype=jnp.float32)
    logits_odd = jax.block_until_ready(
        categorical_net_forward(x_odd, prepared, out_dtype=jnp.float32,
                                use_pallas=True))
    assert logits_odd.shape == (5, A)
    assert jnp.allclose(logits_odd, reference_forward_bf16(x_odd, params),
                        atol=2e-3, rtol=2e-3), "mismatch on padded batch"

    # Auto tiny-shape fallback (plain XLA) agrees with the kernel path.
    logits_fb = jax.block_until_ready(
        categorical_net_forward(x, prepared, out_dtype=jnp.float32))
    assert jnp.allclose(logits_fb, ref_bf16, atol=2e-3, rtol=2e-3), \
        "mismatch on XLA fallback"

    print("KERNEL_OK")
</pallas_src>

<mosaic_0001>
module attributes {stable_mosaic.version = 11 : i64} {
  func.func @categorical_net_kernel(%arg0: i32, %arg1: memref<16x128xbf16, #tpu.memory_space<vmem>>, %arg2: memref<128x128xbf16, #tpu.memory_space<vmem>>, %arg3: memref<1x128xf32, #tpu.memory_space<vmem>>, %arg4: memref<128x128xbf16, #tpu.memory_space<vmem>>, %arg5: memref<1x128xf32, #tpu.memory_space<vmem>>, %arg6: memref<128x128xbf16, #tpu.memory_space<vmem>>, %arg7: memref<1x128xf32, #tpu.memory_space<vmem>>, %arg8: memref<16x128xf32, #tpu.memory_space<vmem>>) attributes {dimension_semantics = [#tpu.dimension_semantics<parallel>], iteration_bounds = array<i64: 1>, scalar_prefetch = 0 : i64, scratch_operands = 0 : i64, tpu.core_type = #tpu.core_type<tc>, window_params = [{transform_indices = @transform_0, window_bounds = array<i64: 16, 128>}, {pipeline_mode = #tpu.pipeline_mode<synchronous>, transform_indices = @transform_1, window_bounds = array<i64: 128, 128>}, {pipeline_mode = #tpu.pipeline_mode<synchronous>, transform_indices = @transform_2, window_bounds = array<i64: 1, 128>}, {pipeline_mode = #tpu.pipeline_mode<synchronous>, transform_indices = @transform_3, window_bounds = array<i64: 128, 128>}, {pipeline_mode = #tpu.pipeline_mode<synchronous>, transform_indices = @transform_4, window_bounds = array<i64: 1, 128>}, {pipeline_mode = #tpu.pipeline_mode<synchronous>, transform_indices = @transform_5, window_bounds = array<i64: 128, 128>}, {pipeline_mode = #tpu.pipeline_mode<synchronous>, transform_indices = @transform_6, window_bounds = array<i64: 1, 128>}, {transform_indices = @transform_7, window_bounds = array<i64: 16, 128>}]} {
    %c0 = arith.constant 0 : index
    %c0_0 = arith.constant 0 : index
    %0 = vector.load %arg1[%c0, %c0_0] : memref<16x128xbf16, #tpu.memory_space<vmem>>, vector<16x128xbf16>
    %c0_1 = arith.constant 0 : index
    %c0_2 = arith.constant 0 : index
    %1 = vector.load %arg2[%c0_1, %c0_2] : memref<128x128xbf16, #tpu.memory_space<vmem>>, vector<128x128xbf16>
    %cst = arith.constant dense<0.000000e+00> : vector<16x128xf32>
    %2 = tpu.matmul %0, %1, %cst {dimension_numbers = #tpu.dot_dimension_numbers<[1], [0], [0], [1], [0, 0, 1, 1], [], []>} : vector<16x128xbf16>, vector<128x128xbf16>, vector<16x128xf32> -> vector<16x128xf32>
    %c0_3 = arith.constant 0 : index
    %c0_4 = arith.constant 0 : index
    %3 = vector.load %arg3[%c0_3, %c0_4] : memref<1x128xf32, #tpu.memory_space<vmem>>, vector<1x128xf32>
    %4 = vector.broadcast %3 : vector<1x128xf32> to vector<16x128xf32>
    %5 = arith.addf %2, %4 : vector<16x128xf32>
    %cst_5 = arith.constant 0.000000e+00 : f32
    %6 = vector.broadcast %cst_5 : f32 to vector<16x128xf32>
    %7 = arith.maximumf %5, %6 : vector<16x128xf32>
    %8 = arith.truncf %7 : vector<16x128xf32> to vector<16x128xbf16>
    %c0_6 = arith.constant 0 : index
    %c0_7 = arith.constant 0 : index
    %9 = vector.load %arg4[%c0_6, %c0_7] : memref<128x128xbf16, #tpu.memory_space<vmem>>, vector<128x128xbf16>
    %cst_8 = arith.constant dense<0.000000e+00> : vector<16x128xf32>
    %10 = tpu.matmul %8, %9, %cst_8 {dimension_numbers = #tpu.dot_dimension_numbers<[1], [0], [0], [1], [0, 0, 1, 1], [], []>} : vector<16x128xbf16>, vector<128x128xbf16>, vector<16x128xf32> -> vector<16x128xf32>
    %c0_9 = arith.constant 0 : index
    %c0_10 = arith.constant 0 : index
    %11 = vector.load %arg5[%c0_9, %c0_10] : memref<1x128xf32, #tpu.memory_space<vmem>>, vector<1x128xf32>
    %12 = vector.broadcast %11 : vector<1x128xf32> to vector<16x128xf32>
    %13 = arith.addf %10, %12 : vector<16x128xf32>
    %cst_11 = arith.constant 0.000000e+00 : f32
    %14 = vector.broadcast %cst_11 : f32 to vector<16x128xf32>
    %15 = arith.maximumf %13, %14 : vector<16x128xf32>
    %16 = arith.truncf %15 : vector<16x128xf32> to vector<16x128xbf16>
    %c0_12 = arith.constant 0 : index
    %c0_13 = arith.constant 0 : index
    %17 = vector.load %arg6[%c0_12, %c0_13] : memref<128x128xbf16, #tpu.memory_space<vmem>>, vector<128x128xbf16>
    %cst_14 = arith.constant dense<0.000000e+00> : vector<16x128xf32>
    %18 = tpu.matmul %16, %17, %cst_14 {dimension_numbers = #tpu.dot_dimension_numbers<[1], [0], [0], [1], [0, 0, 1, 1], [], []>} : vector<16x128xbf16>, vector<128x128xbf16>, vector<16x128xf32> -> vector<16x128xf32>
    %c0_15 = arith.constant 0 : index
    %c0_16 = arith.constant 0 : index
    %19 = vector.load %arg7[%c0_15, %c0_16] : memref<1x128xf32, #tpu.memory_space<vmem>>, vector<1x128xf32>
    %20 = vector.broadcast %19 : vector<1x128xf32> to vector<16x128xf32>
    %21 = arith.addf %18, %20 : vector<16x128xf32>
    %cst_17 = arith.constant dense<0xFF800000> : vector<16xf32>
    %22 = vector.multi_reduction <maximumf>, %21, %cst_17 [1] : vector<16x128xf32> to vector<16xf32>
    %23 = vector.shape_cast %22 : vector<16xf32> to vector<16x1xf32>
    %24 = vector.broadcast %23 : vector<16x1xf32> to vector<16x128xf32>
    %25 = arith.subf %21, %24 : vector<16x128xf32>
    %26 = math.exp %25 : vector<16x128xf32>
    %cst_18 = arith.constant dense<0.000000e+00> : vector<16xf32>
    %27 = vector.multi_reduction <add>, %26, %cst_18 [1] : vector<16x128xf32> to vector<16xf32>
    %28 = vector.shape_cast %27 : vector<16xf32> to vector<16x1xf32>
    %29 = math.log %28 : vector<16x1xf32>
    %30 = vector.broadcast %29 : vector<16x1xf32> to vector<16x128xf32>
    %31 = arith.subf %25, %30 : vector<16x128xf32>
    %c0_19 = arith.constant 0 : index
    %c0_20 = arith.constant 0 : index
    %32 = vector.load %arg8[%c0_19, %c0_20] : memref<16x128xf32, #tpu.memory_space<vmem>>, vector<16x128xf32>
    tpu.vector_store %arg8[%c0_19, %c0_20], %31 {strides = array<i32>} : memref<16x128xf32, #tpu.memory_space<vmem>>, vector<16x128xf32>,
    return
  }
  func.func @transform_0(%arg0: i32) -> (i32, i32) {
    %c0_i32 = arith.constant 0 : i32
    %c0_i32_0 = arith.constant 0 : i32
    return %arg0, %c0_i32 : i32, i32
  }
  func.func @transform_1(%arg0: i32) -> (i32, i32) {
    %c0_i32 = arith.constant 0 : i32
    %c0_i32_0 = arith.constant 0 : i32
    %c0_i32_1 = arith.constant 0 : i32
    return %c0_i32, %c0_i32_0 : i32, i32
  }
  func.func @transform_2(%arg0: i32) -> (i32, i32) {
    %c0_i32 = arith.constant 0 : i32
    %c0_i32_0 = arith.constant 0 : i32
    %c0_i32_1 = arith.constant 0 : i32
    return %c0_i32, %c0_i32_0 : i32, i32
  }
  func.func @transform_3(%arg0: i32) -> (i32, i32) {
    %c0_i32 = arith.constant 0 : i32
    %c0_i32_0 = arith.constant 0 : i32
    %c0_i32_1 = arith.constant 0 : i32
    return %c0_i32, %c0_i32_0 : i32, i32
  }
  func.func @transform_4(%arg0: i32) -> (i32, i32) {
    %c0_i32 = arith.constant 0 : i32
    %c0_i32_0 = arith.constant 0 : i32
    %c0_i32_1 = arith.constant 0 : i32
    return %c0_i32, %c0_i32_0 : i32, i32
  }
  func.func @transform_5(%arg0: i32) -> (i32, i32) {
    %c0_i32 = arith.constant 0 : i32
    %c0_i32_0 = arith.constant 0 : i32
    %c0_i32_1 = arith.constant 0 : i32
    return %c0_i32, %c0_i32_0 : i32, i32
  }
  func.func @transform_6(%arg0: i32) -> (i32, i32) {
    %c0_i32 = arith.constant 0 : i32
    %c0_i32_0 = arith.constant 0 : i32
    %c0_i32_1 = arith.constant 0 : i32
    return %c0_i32, %c0_i32_0 : i32, i32
  }
  func.func @transform_7(%arg0: i32) -> (i32, i32) {
    %c0_i32 = arith.constant 0 : i32
    %c0_i32_0 = arith.constant 0 : i32
    return %arg0, %c0_i32 : i32, i32
  }
}

module attributes {stable_mosaic.version = 11 : i64} {
  func.func @categorical_net_kernel(%arg0: i32, %arg1: memref<16x128xbf16, #tpu.memory_space<vmem>>, %arg2: memref<128x128xbf16, #tpu.memory_space<vmem>>, %arg3: memref<1x128xf32, #tpu.memory_space<vmem>>, %arg4: memref<128x128xbf16, #tpu.memory_space<vmem>>, %arg5: memref<1x128xf32, #tpu.memory_space<vmem>>, %arg6: memref<128x128xbf16, #tpu.memory_space<vmem>>, %arg7: memref<1x128xf32, #tpu.memory_space<vmem>>, %arg8: memref<16x128xf32, #tpu.memory_space<vmem>>) attributes {dimension_semantics = [#tpu.dimension_semantics<parallel>], iteration_bounds = array<i64: 1>, scalar_prefetch = 0 : i64, scratch_operands = 0 : i64, tpu.core_type = #tpu.core_type<tc>, window_params = [{transform_indices = @transform_0, window_bounds = array<i64: 16, 128>}, {pipeline_mode = #tpu.pipeline_mode<synchronous>, transform_indices = @transform_1, window_bounds = array<i64: 128, 128>}, {pipeline_mode = #tpu.pipeline_mode<synchronous>, transform_indices = @transform_2, window_bounds = array<i64: 1, 128>}, {pipeline_mode = #tpu.pipeline_mode<synchronous>, transform_indices = @transform_3, window_bounds = array<i64: 128, 128>}, {pipeline_mode = #tpu.pipeline_mode<synchronous>, transform_indices = @transform_4, window_bounds = array<i64: 1, 128>}, {pipeline_mode = #tpu.pipeline_mode<synchronous>, transform_indices = @transform_5, window_bounds = array<i64: 128, 128>}, {pipeline_mode = #tpu.pipeline_mode<synchronous>, transform_indices = @transform_6, window_bounds = array<i64: 1, 128>}, {transform_indices = @transform_7, window_bounds = array<i64: 16, 128>}]} {
    %c0 = arith.constant 0 : index
    %c0_0 = arith.constant 0 : index
    %0 = vector.load %arg1[%c0, %c0_0] : memref<16x128xbf16, #tpu.memory_space<vmem>>, vector<16x128xbf16>
    %c0_1 = arith.constant 0 : index
    %c0_2 = arith.constant 0 : index
    %1 = vector.load %arg2[%c0_1, %c0_2] : memref<128x128xbf16, #tpu.memory_space<vmem>>, vector<128x128xbf16>
    %cst = arith.constant dense<0.000000e+00> : vector<16x128xf32>
    %2 = tpu.matmul %0, %1, %cst {dimension_numbers = #tpu.dot_dimension_numbers<[1], [0], [0], [1], [0, 0, 1, 1], [], []>} : vector<16x128xbf16>, vector<128x128xbf16>, vector<16x128xf32> -> vector<16x128xf32>
    %c0_3 = arith.constant 0 : index
    %c0_4 = arith.constant 0 : index
    %3 = vector.load %arg3[%c0_3, %c0_4] : memref<1x128xf32, #tpu.memory_space<vmem>>, vector<1x128xf32>
    %4 = vector.broadcast %3 : vector<1x128xf32> to vector<16x128xf32>
    %5 = arith.addf %2, %4 : vector<16x128xf32>
    %cst_5 = arith.constant 0.000000e+00 : f32
    %6 = vector.broadcast %cst_5 : f32 to vector<16x128xf32>
    %7 = arith.maximumf %5, %6 : vector<16x128xf32>
    %8 = arith.truncf %7 : vector<16x128xf32> to vector<16x128xbf16>
    %c0_6 = arith.constant 0 : index
    %c0_7 = arith.constant 0 : index
    %9 = vector.load %arg4[%c0_6, %c0_7] : memref<128x128xbf16, #tpu.memory_space<vmem>>, vector<128x128xbf16>
    %cst_8 = arith.constant dense<0.000000e+00> : vector<16x128xf32>
    %10 = tpu.matmul %8, %9, %cst_8 {dimension_numbers = #tpu.dot_dimension_numbers<[1], [0], [0], [1], [0, 0, 1, 1], [], []>} : vector<16x128xbf16>, vector<128x128xbf16>, vector<16x128xf32> -> vector<16x128xf32>
    %c0_9 = arith.constant 0 : index
    %c0_10 = arith.constant 0 : index
    %11 = vector.load %arg5[%c0_9, %c0_10] : memref<1x128xf32, #tpu.memory_space<vmem>>, vector<1x128xf32>
    %12 = vector.broadcast %11 : vector<1x128xf32> to vector<16x128xf32>
    %13 = arith.addf %10, %12 : vector<16x128xf32>
    %cst_11 = arith.constant 0.000000e+00 : f32
    %14 = vector.broadcast %cst_11 : f32 to vector<16x128xf32>
    %15 = arith.maximumf %13, %14 : vector<16x128xf32>
    %16 = arith.truncf %15 : vector<16x128xf32> to vector<16x128xbf16>
    %c0_12 = arith.constant 0 : index
    %c0_13 = arith.constant 0 : index
    %17 = vector.load %arg6[%c0_12, %c0_13] : memref<128x128xbf16, #tpu.memory_space<vmem>>, vector<128x128xbf16>
    %cst_14 = arith.constant dense<0.000000e+00> : vector<16x128xf32>
    %18 = tpu.matmul %16, %17, %cst_14 {dimension_numbers = #tpu.dot_dimension_numbers<[1], [0], [0], [1], [0, 0, 1, 1], [], []>} : vector<16x128xbf16>, vector<128x128xbf16>, vector<16x128xf32> -> vector<16x128xf32>
    %c0_15 = arith.constant 0 : index
    %c0_16 = arith.constant 0 : index
    %19 = vector.load %arg7[%c0_15, %c0_16] : memref<1x128xf32, #tpu.memory_space<vmem>>, vector<1x128xf32>
    %20 = vector.broadcast %19 : vector<1x128xf32> to vector<16x128xf32>
    %21 = arith.addf %18, %20 : vector<16x128xf32>
    %cst_17 = arith.constant dense<0xFF800000> : vector<16xf32>
    %22 = vector.multi_reduction <maximumf>, %21, %cst_17 [1] : vector<16x128xf32> to vector<16xf32>
    %23 = vector.shape_cast %22 : vector<16xf32> to vector<16x1xf32>
    %24 = vector.broadcast %23 : vector<16x1xf32> to vector<16x128xf32>
    %25 = arith.subf %21, %24 : vector<16x128xf32>
    %26 = math.exp %25 : vector<16x128xf32>
    %cst_18 = arith.constant dense<0.000000e+00> : vector<16xf32>
    %27 = vector.multi_reduction <add>, %26, %cst_18 [1] : vector<16x128xf32> to vector<16xf32>
    %28 = vector.shape_cast %27 : vector<16xf32> to vector<16x1xf32>
    %29 = math.log %28 : vector<16x1xf32>
    %30 = vector.broadcast %29 : vector<16x1xf32> to vector<16x128xf32>
    %31 = arith.subf %25, %30 : vector<16x128xf32>
    %c0_19 = arith.constant 0 : index
    %c0_20 = arith.constant 0 : index
    %32 = vector.load %arg8[%c0_19, %c0_20] : memref<16x128xf32, #tpu.memory_space<vmem>>, vector<16x128xf32>
    tpu.vector_store %arg8[%c0_19, %c0_20], %31 {strides = array<i32>} : memref<16x128xf32, #tpu.memory_space<vmem>>, vector<16x128xf32>,
    return
  }
  func.func @transform_0(%arg0: i32) -> (i32, i32) {
    %c0_i32 = arith.constant 0 : i32
    %c0_i32_0 = arith.constant 0 : i32
    return %arg0, %c0_i32 : i32, i32
  }
  func.func @transform_1(%arg0: i32) -> (i32, i32) {
    %c0_i32 = arith.constant 0 : i32
    %c0_i32_0 = arith.constant 0 : i32
    %c0_i32_1 = arith.constant 0 : i32
    return %c0_i32, %c0_i32_0 : i32, i32
  }
  func.func @transform_2(%arg0: i32) -> (i32, i32) {
    %c0_i32 = arith.constant 0 : i32
    %c0_i32_0 = arith.constant 0 : i32
    %c0_i32_1 = arith.constant 0 : i32
    return %c0_i32, %c0_i32_0 : i32, i32
  }
  func.func @transform_3(%arg0: i32) -> (i32, i32) {
    %c0_i32 = arith.constant 0 : i32
    %c0_i32_0 = arith.constant 0 : i32
    %c0_i32_1 = arith.constant 0 : i32
    return %c0_i32, %c0_i32_0 : i32, i32
  }
  func.func @transform_4(%arg0: i32) -> (i32, i32) {
    %c0_i32 = arith.constant 0 : i32
    %c0_i32_0 = arith.constant 0 : i32
    %c0_i32_1 = arith.constant 0 : i32
    return %c0_i32, %c0_i32_0 : i32, i32
  }
  func.func @transform_5(%arg0: i32) -> (i32, i32) {
    %c0_i32 = arith.constant 0 : i32
    %c0_i32_0 = arith.constant 0 : i32
    %c0_i32_1 = arith.constant 0 : i32
    return %c0_i32, %c0_i32_0 : i32, i32
  }
  func.func @transform_6(%arg0: i32) -> (i32, i32) {
    %c0_i32 = arith.constant 0 : i32
    %c0_i32_0 = arith.constant 0 : i32
    %c0_i32_1 = arith.constant 0 : i32
    return %c0_i32, %c0_i32_0 : i32, i32
  }
  func.func @transform_7(%arg0: i32) -> (i32, i32) {
    %c0_i32 = arith.constant 0 : i32
    %c0_i32_0 = arith.constant 0 : i32
    return %arg0, %c0_i32 : i32, i32
  }
}

</mosaic_0001>

<bundles_post_ra>
// kernel: _pallas_forward.1
= control target key start
LH: loop header
LB: loop body
LE: loop exit
PB: predicated region body
PF: predicated region fallthrough
CT: control target
= control target key end

     0   :  { %12 = vsyncpa [#allocation3], 0  ;;  %s818_s0 = inlined_call_operand.vmem [shape: bf16[16,128], index: 0, kind: input, shape index: {}]   ;;  %s819_s1 = inlined_call_operand.hbm [shape: bf16[128,128], index: 1, kind: input, shape index: {}]   ;;  %s820_s2 = inlined_call_operand.vmem [shape: f32[1,128], index: 2, kind: input, shape index: {}]   ;;  %s821_s3 = inlined_call_operand.hbm [shape: bf16[128,128], index: 3, kind: input, shape index: {}]   ;;  %s822_s4 = inlined_call_operand.vmem [shape: f32[1,128], index: 4, kind: input, shape index: {}]   ;;  %s823_s5 = inlined_call_operand.hbm [shape: bf16[128,128], index: 5, kind: input, shape index: {}]   ;;  %s824_s6 = inlined_call_operand.vmem [shape: f32[1,128], index: 6, kind: input, shape index: {}]   ;;  %s825_s7 = inlined_call_operand.vmem [shape: f32[16,128], index: 7, kind: output, shape index: {}]  }
   0x1   :  { %13 = vsyncpa [#allocation5], 0  ;;  %s671_s24 = smov [#allocation4]   ;;  %s672_s26 = smov [#allocation2]  }
   0x2   :  { %s35_s25 = sshll.u32 %s671_s24, 4  ;;  %s21_s27 = sshll.u32 %s672_s26, 4  ;;  %s36_s25 = int_to_ptr.vmem [resolvable:$true] %s35_s25  ;;  %s718_s27 = int_to_ptr.vmem [resolvable:$true] %s21_s27 }
   0x3   :  { %s601_s30 = scalar_lea.hbm %s821_s3, 1024 }
   0x4   :  { %p602_p0 = scmp.ne.s32.totalorder %s821_s3, %s601_s30  ;;  %p605_p1 = scmp.lt.u32.totalorder %s601_s30, %s821_s3 }
   0x6   :  { %p607_p2 = pnand %p605_p1, %p602_p0 }
   0x8   :  { %610 = shalt.err (!%p607_p2)
}
   0x9   :  { %s611_s12 = scalar_lea.vmem %s36_s25, 1024  ;;  %p616_p4 = scmp.lt.s32.totalorder %s36_s25, %s36_s25 }
   0xa   :  { %p612_p3 = scmp.ne.s32.totalorder %s36_s25, %s611_s12  ;;  %p617_p5 = scmp.lt.s32.totalorder %s611_s12, %s611_s12 }
   0xc   :  { %p618_p6 = por %p617_p5, %p616_p4 }
   0xe   :  { %p619_p7 = pnand %p618_p6, %p612_p3 }
  0x10   :  { %622 = shalt.err (!%p619_p7)
}
  0x11   :  { %s673_s13 = smov 64   ;;  %s674_s14 = smov 4  }
  0x12   :  { %41 = dma.hbm_to_vmem [thread:$0]  %s821_s3, 1024, %s36_s25, [#allocation5], %s673_s13, %s673_s13, %s674_s14  }
  0x13   :  { %s623_s19 = scalar_lea.hbm %s819_s1, 1024 }
  0x14   :  { %p624_p8 = scmp.ne.s32.totalorder %s819_s1, %s623_s19  ;;  %p627_p9 = scmp.lt.u32.totalorder %s623_s19, %s819_s1 }
  0x16   :  { %p629_p10 = pnand %p627_p9, %p624_p8 }
  0x18   :  { %632 = shalt.err (!%p629_p10)
}
  0x19   :  { %s633_s24 = scalar_lea.vmem %s718_s27, 1024  ;;  %p638_p12 = scmp.lt.s32.totalorder %s718_s27, %s718_s27 }
  0x1a   :  { %p634_p11 = scmp.ne.s32.totalorder %s718_s27, %s633_s24  ;;  %p639_p13 = scmp.lt.s32.totalorder %s633_s24, %s633_s24 }
  0x1c   :  { %p640_p0 = por %p639_p13, %p638_p12 }
  0x1e   :  { %p641_p1 = pnand %p640_p0, %p634_p11 }
  0x20   :  { %644 = shalt.err (!%p641_p1)
}
  0x21   :  { %27 = dma.hbm_to_vmem [thread:$0]  %s819_s1, 1024, %s718_s27, [#allocation3], %s673_s13, %s673_s13, %s674_s14  }
  0x22   :  { %s675_s26 = smov [#allocation6]   ;;  %s645_s8 = scalar_lea.hbm %s823_s5, 1024 }
  0x23   :  { %s49_s28 = sshll.u32 %s675_s26, 4  ;;  %p646_p2 = scmp.ne.s32.totalorder %s823_s5, %s645_s8  ;;  %s50_s28 = int_to_ptr.vmem [resolvable:$true] %s49_s28 }
  0x24   :  { %p649_p3 = scmp.lt.u32.totalorder %s645_s8, %s823_s5 }
  0x26   :  { %p651_p4 = pnand %p649_p3, %p646_p2 }
  0x28   :  { %654 = shalt.err (!%p651_p4)
}
  0x29   :  { %s655_s15 = scalar_lea.vmem %s50_s28, 1024  ;;  %p660_p6 = scmp.lt.s32.totalorder %s50_s28, %s50_s28 }
  0x2a   :  { %p656_p5 = scmp.ne.s32.totalorder %s50_s28, %s655_s15  ;;  %p661_p7 = scmp.lt.s32.totalorder %s655_s15, %s655_s15 }
  0x2c   :  { %p662_p8 = por %p661_p7, %p660_p6 }
  0x2e   :  { %p663_p9 = pnand %p662_p8, %p656_p5 }
  0x30   :  { %666 = shalt.err (!%p663_p9)
}
  0x31   :  { %55 = dma.hbm_to_vmem [thread:$0]  %s823_s5, 1024, %s50_s28, [#allocation5], %s673_s13, %s673_s13, %s674_s14  }
  0x32   :  { %667 = dma.done.wait [#allocation3], 1024  }
  0x33   :  { %668 = vsyncadd [#allocation3], 4294966272 }
  0x34   :  { %669 = dma.done.wait [#allocation5], 2048  }
  0x35   :  { %670 = vsyncadd [#allocation5], 4294965248  ;;  %v676_v0 = vmov 0.0   ;;  %vm677_vm0 = vmmov 0   ;;  %v568_v1 = vld [vmem:[#allocation2] sm:$0xff]   ;;  %v569_v2 = vld [vmem:[#allocation2 + $0x8] sm:$0xff]  }
  0x36   :  { %501 = vmatprep.subr.bf16.mxu0 %v676_v0  ;;  %517 = vmatprep.mubr.msk.bf16.mxu0 %vm677_vm0, %v676_v0  ;;  %v570_v3 = vld [vmem:[#allocation2 + $0x10] sm:$0xff]   ;;  %v577_v4 = vld [vmem:[#allocation4] sm:$0xff]   ;;  %v571_v5 = vld [vmem:[#allocation2 + $0x18] sm:$0xff]  }
  0x37   :  { %521 = vmatprep.subr.bf16.mxu1 %v676_v0  ;;  %537 = vmatprep.mubr.msk.bf16.mxu1 %vm677_vm0, %v676_v0  ;;  %v578_v6 = vld [vmem:[#allocation4 + $0x8] sm:$0xff]   ;;  %v572_v7 = vld [vmem:[#allocation2 + $0x20] sm:$0xff]   ;;  %v579_v8 = vld [vmem:[#allocation4 + $0x10] sm:$0xff]  }
  0x38   :  { %502 = vmatpush3.bf16.msra.mxu0 %v568_v1  ;;  %522 = vmatpush3.bf16.msra.mxu1 %v577_v4  ;;  %v573_v9 = vld [vmem:[#allocation2 + $0x28] sm:$0xff]   ;;  %v580_v10 = vld [vmem:[#allocation4 + $0x18] sm:$0xff]   ;;  %v574_v11 = vld [vmem:[#allocation2 + $0x30] sm:$0xff]  }
  0x39   :  { %503 = vmatprep.subr.bf16.mxu0 %v676_v0  ;;  %523 = vmatprep.subr.bf16.mxu1 %v676_v0  ;;  %v581_v12 = vld [vmem:[#allocation4 + $0x20] sm:$0xff]   ;;  %v575_v13 = vld [vmem:[#allocation2 + $0x38] sm:$0xff]   ;;  %v582_v14 = vld [vmem:[#allocation4 + $0x28] sm:$0xff]  }
  0x3a   :  { %v576_v15 = vld [vmem:[%s818_s0] sm:$0xff]   ;;  %v583_v16 = vld [vmem:[#allocation4 + $0x30] sm:$0xff]   ;;  %v584_v17 = vld [vmem:[#allocation4 + $0x38] sm:$0xff]  }
  0x3b   :  { %v585_v18 = vld [vmem:[#allocation6] sm:$0xff]   ;;  %v586_v19 = vld [vmem:[#allocation6 + $0x8] sm:$0xff]   ;;  %v587_v20 = vld [vmem:[#allocation6 + $0x10] sm:$0xff]  }
  0x3c   :  { %504 = vmatpush3.bf16.msra.mxu0 %v569_v2  ;;  %524 = vmatpush3.bf16.msra.mxu1 %v578_v6  ;;  %v588_v21 = vld [vmem:[#allocation6 + $0x18] sm:$0xff]   ;;  %v589_v22 = vld [vmem:[#allocation6 + $0x20] sm:$0xff]   ;;  %v590_v23 = vld [vmem:[#allocation6 + $0x28] sm:$0xff]  }
  0x3d   :  { %505 = vmatprep.subr.bf16.mxu0 %v676_v0  ;;  %525 = vmatprep.subr.bf16.mxu1 %v676_v0  ;;  %v446_v24 = vld [vmem:[%s820_s2] ss:$0 sm:$0xff]  ;;  %v591_v34 = vld [vmem:[#allocation6 + $0x30] sm:$0xff]   ;;  %v592_v35 = vld [vmem:[#allocation6 + $0x38] sm:$0xff]  }
  0x3e   :  { %v456_v36 = vld [vmem:[%s822_s4] ss:$0 sm:$0xff] }
  0x3f   :  { %v465_v46 = vld [vmem:[%s824_s6] ss:$0 sm:$0xff] }
  0x40   :  { %506 = vmatpush3.bf16.msra.mxu0 %v570_v3  ;;  %526 = vmatpush3.bf16.msra.mxu1 %v579_v8 }
  0x41   :  { %507 = vmatprep.subr.bf16.mxu0 %v676_v0  ;;  %527 = vmatprep.subr.bf16.mxu1 %v676_v0 }
  0x44   :  { %508 = vmatpush3.bf16.msra.mxu0 %v571_v5  ;;  %528 = vmatpush3.bf16.msra.mxu1 %v580_v10 }
  0x45   :  { %509 = vmatprep.subr.bf16.mxu0 %v676_v0  ;;  %529 = vmatprep.subr.bf16.mxu1 %v676_v0 }
  0x48   :  { %510 = vmatpush3.bf16.msra.mxu0 %v572_v7  ;;  %530 = vmatpush3.bf16.msra.mxu1 %v581_v12 }
  0x49   :  { %511 = vmatprep.subr.bf16.mxu0 %v676_v0  ;;  %531 = vmatprep.subr.bf16.mxu1 %v676_v0 }
  0x4c   :  { %512 = vmatpush3.bf16.msra.mxu0 %v573_v9  ;;  %532 = vmatpush3.bf16.msra.mxu1 %v582_v14 }
  0x4d   :  { %513 = vmatprep.subr.bf16.mxu0 %v676_v0  ;;  %533 = vmatprep.subr.bf16.mxu1 %v676_v0 }
  0x50   :  { %514 = vmatpush3.bf16.msra.mxu0 %v574_v11  ;;  %534 = vmatpush3.bf16.msra.mxu1 %v583_v16 }
  0x51   :  { %515 = vmatprep.subr.bf16.mxu0 %v676_v0  ;;  %535 = vmatprep.subr.bf16.mxu1 %v676_v0 }
  0x54   :  { %516 = vmatpush3.bf16.msra.mxu0 %v575_v13  ;;  %536 = vmatpush3.bf16.msra.mxu1 %v584_v17 }
  0x55   :  { %541 = vmatprep.subr.bf16.mxu0 %v676_v0 }
  0x57   :  { %518 = vmatmul.mubr.bf16.vlgmr.msra.gmra.mrb[0].mxu0 %v576_v15 }
  0x58   :  { %557 = vmatprep.mubr.msk.bf16.mxu0 %vm677_vm0, %v676_v0  ;;  %542 = vmatpush3.bf16.msra.mxu0 %v585_v18 }
  0x59   :  { %543 = vmatprep.subr.bf16.mxu0 %v676_v0 }
  0x5c   :  { %544 = vmatpush3.bf16.msra.mxu0 %v586_v19 }
  0x5d   :  { %545 = vmatprep.subr.bf16.mxu0 %v676_v0 }
  0x60   :  { %546 = vmatpush3.bf16.msra.mxu0 %v587_v20 }
  0x61   :  { %547 = vmatprep.subr.bf16.mxu0 %v676_v0 }
  0x64   :  { %548 = vmatpush3.bf16.msra.mxu0 %v588_v21 }
  0x65   :  { %549 = vmatprep.subr.bf16.mxu0 %v676_v0 }
  0x68   :  { %550 = vmatpush3.bf16.msra.mxu0 %v589_v22 }
  0x69   :  { %551 = vmatprep.subr.bf16.mxu0 %v676_v0 }
  0x6c   :  { %552 = vmatpush3.bf16.msra.mxu0 %v590_v23 }
  0x6d   :  { %553 = vmatprep.subr.bf16.mxu0 %v676_v0 }
  0x70   :  { %554 = vmatpush3.bf16.msra.mxu0 %v591_v34 }
  0x71   :  { %555 = vmatprep.subr.bf16.mxu0 %v676_v0 }
  0x74   :  { %556 = vmatpush3.bf16.msra.mxu0 %v592_v35 }
 0x12a   :  { %v181_v25 = vpop.f32.mrb[0].mxu0 }
 0x12b   :  { %v182_v26 = vadd.f32 %v446_v24, %v181_v25  ;;  %v519_v27 = vpop.f32.mrb[1].mxu0 }
 0x12c   :  { %v184_v28 = vpop.f32.mrb[2].mxu0 }
 0x12d   :  { %v185_v29 = vadd.f32 %v446_v24, %v184_v28  ;;  %v520_v30 = vpop.f32.mrb[3].mxu0  ;;  %v188_v31 = vmax.f32 %v182_v26, 0.0 }
 0x12f   :  { %v189_v32 = vmax.f32 %v185_v29, 0.0 }
 0x131   :  { %v190_v33 = vpack.c.bf16 %v189_v32, %v188_v31 }
 0x133   :  { %538 = vmatmul.mubr.bf16.vlgmr.msra.gmra.mrb[0].mxu1 %v190_v33 }
 0x206   :  { %v296_v37 = vpop.f32.mrb[0].mxu1 }
 0x207   :  { %v297_v38 = vadd.f32 %v456_v36, %v296_v37  ;;  %v539_v39 = vpop.f32.mrb[1].mxu1 }
 0x208   :  { %v299_v40 = vpop.f32.mrb[2].mxu1 }
 0x209   :  { %v300_v41 = vadd.f32 %v456_v36, %v299_v40  ;;  %v540_v42 = vpop.f32.mrb[3].mxu1  ;;  %v303_v43 = vmax.f32 %v297_v38, 0.0 }
 0x20b   :  { %v304_v44 = vmax.f32 %v300_v41, 0.0 }
 0x20d   :  { %v305_v45 = vpack.c.bf16 %v304_v44, %v303_v43 }
 0x20f   :  { %558 = vmatmul.mubr.bf16.vlgmr.msra.gmra.mrb[4].mxu0 %v305_v45 }
 0x2e2   :  { %v411_v47 = vpop.f32.mrb[4].mxu0 }
 0x2e3   :  { %v412_v48 = vadd.f32 %v465_v46, %v411_v47  ;;  %v559_v49 = vpop.f32.mrb[5].mxu0 }
 0x2e4   :  { %v414_v50 = vpop.f32.mrb[6].mxu0 }
 0x2e5   :  { %418 = vmax.xlane.f32.xlu0 %v412_v48  ;;  %v560_v51 = vpop.f32.mrb[7].mxu0  ;;  %v415_v52 = vadd.f32 %v465_v46, %v414_v50 }
 0x2e9   :  { %420 = vmax.xlane.f32.xlu0 %v415_v52 }
 0x372   :  { %v419_v53 = vpop.xlane.xlu0 %418 }
 0x373   :  { %v422_v54 = vsub.f32 %v412_v48, %v419_v53 }
 0x375   :  { %v424_v55 = vmul.f32 1.442695, %v422_v54 }
 0x376   :  { %v421_v56 = vpop.xlane.xlu0 %420 }
 0x377   :  { %v423_v57 = vsub.f32 %v415_v52, %v421_v56  ;;  %593 = vpow2.f32 %v424_v55 }
 0x379   :  { %v426_v58 = vmul.f32 1.442695, %v423_v57 }
 0x37b   :  { %595 = vpow2.f32 %v426_v58 }
 0x381   :  { %v594_v59 = vpop.eup %593 }
 0x382   :  { %428 = vadd.xlane.f32.xlu1 %v594_v59 }
 0x385   :  { %v596_v60 = vpop.eup %595 }
 0x386   :  { %430 = vadd.xlane.f32.xlu1 %v596_v60 }
 0x40f   :  { %v429_v61 = vpop.xlane.xlu1 %428 }
 0x410   :  { %597 = vlog2.f32 %v429_v61 }
 0x413   :  { %v431_v62 = vpop.xlane.xlu1 %430 }
 0x414   :  { %599 = vlog2.f32 %v431_v62 }
 0x41a   :  { %v598_v63 = vpop.eup %597 }
 0x41b   :  { %v433_v0 = vmul.f32 0.6931472, %v598_v63 }
 0x41d   :  { %v436_v1 = vsub.f32 %v422_v54, %v433_v0 }
 0x41e   :  { %v600_v2 = vpop.eup %599 }
 0x41f   :  { %438 = vst [vmem:[%s825_s7] sm:$0xff] %v436_v1  ;;  %v435_v3 = vmul.f32 0.6931472, %v600_v2 }
 0x421   :  { %v437_v4 = vsub.f32 %v423_v57, %v435_v3 }
 0x423   :  { %439 = vst [vmem:[%s825_s7 + $0x8] sm:$0xff] %v437_v4 }
 0x424   :  { %444 = vsyncpa [#allocation3], 1 }
 0x425   :  { %445 = vsyncpa [#allocation5], 1 }

// kernel: _pallas_forward.1
= control target key start
LH: loop header
LB: loop body
LE: loop exit
PB: predicated region body
PF: predicated region fallthrough
CT: control target
= control target key end

     0   :  { %12 = vsyncpa [#allocation3], 0  ;;  %s818_s0 = inlined_call_operand.vmem [shape: bf16[16,128], index: 0, kind: input, shape index: {}]   ;;  %s819_s1 = inlined_call_operand.hbm [shape: bf16[128,128], index: 1, kind: input, shape index: {}]   ;;  %s820_s2 = inlined_call_operand.vmem [shape: f32[1,128], index: 2, kind: input, shape index: {}]   ;;  %s821_s3 = inlined_call_operand.hbm [shape: bf16[128,128], index: 3, kind: input, shape index: {}]   ;;  %s822_s4 = inlined_call_operand.vmem [shape: f32[1,128], index: 4, kind: input, shape index: {}]   ;;  %s823_s5 = inlined_call_operand.hbm [shape: bf16[128,128], index: 5, kind: input, shape index: {}]   ;;  %s824_s6 = inlined_call_operand.vmem [shape: f32[1,128], index: 6, kind: input, shape index: {}]   ;;  %s825_s7 = inlined_call_operand.vmem [shape: f32[16,128], index: 7, kind: output, shape index: {}]  }
   0x1   :  { %13 = vsyncpa [#allocation5], 0  ;;  %s671_s24 = smov [#allocation4]   ;;  %s672_s26 = smov [#allocation2]  }
   0x2   :  { %s35_s25 = sshll.u32 %s671_s24, 4  ;;  %s21_s27 = sshll.u32 %s672_s26, 4  ;;  %s36_s25 = int_to_ptr.vmem [resolvable:$true] %s35_s25  ;;  %s718_s27 = int_to_ptr.vmem [resolvable:$true] %s21_s27 }
   0x3   :  { %s601_s30 = scalar_lea.hbm %s821_s3, 1024 }
   0x4   :  { %p602_p0 = scmp.ne.s32.totalorder %s821_s3, %s601_s30  ;;  %p605_p1 = scmp.lt.u32.totalorder %s601_s30, %s821_s3 }
   0x6   :  { %p607_p2 = pnand %p605_p1, %p602_p0 }
   0x8   :  { %610 = shalt.err (!%p607_p2)
}
   0x9   :  { %s611_s12 = scalar_lea.vmem %s36_s25, 1024  ;;  %p616_p4 = scmp.lt.s32.totalorder %s36_s25, %s36_s25 }
   0xa   :  { %p612_p3 = scmp.ne.s32.totalorder %s36_s25, %s611_s12  ;;  %p617_p5 = scmp.lt.s32.totalorder %s611_s12, %s611_s12 }
   0xc   :  { %p618_p6 = por %p617_p5, %p616_p4 }
   0xe   :  { %p619_p7 = pnand %p618_p6, %p612_p3 }
  0x10   :  { %622 = shalt.err (!%p619_p7)
}
  0x11   :  { %s673_s13 = smov 64   ;;  %s674_s14 = smov 4  }
  0x12   :  { %41 = dma.hbm_to_vmem [thread:$0]  %s821_s3, 1024, %s36_s25, [#allocation5], %s673_s13, %s673_s13, %s674_s14  }
  0x13   :  { %s623_s19 = scalar_lea.hbm %s819_s1, 1024 }
  0x14   :  { %p624_p8 = scmp.ne.s32.totalorder %s819_s1, %s623_s19  ;;  %p627_p9 = scmp.lt.u32.totalorder %s623_s19, %s819_s1 }
  0x16   :  { %p629_p10 = pnand %p627_p9, %p624_p8 }
  0x18   :  { %632 = shalt.err (!%p629_p10)
}
  0x19   :  { %s633_s24 = scalar_lea.vmem %s718_s27, 1024  ;;  %p638_p12 = scmp.lt.s32.totalorder %s718_s27, %s718_s27 }
  0x1a   :  { %p634_p11 = scmp.ne.s32.totalorder %s718_s27, %s633_s24  ;;  %p639_p13 = scmp.lt.s32.totalorder %s633_s24, %s633_s24 }
  0x1c   :  { %p640_p0 = por %p639_p13, %p638_p12 }
  0x1e   :  { %p641_p1 = pnand %p640_p0, %p634_p11 }
  0x20   :  { %644 = shalt.err (!%p641_p1)
}
  0x21   :  { %27 = dma.hbm_to_vmem [thread:$0]  %s819_s1, 1024, %s718_s27, [#allocation3], %s673_s13, %s673_s13, %s674_s14  }
  0x22   :  { %s675_s26 = smov [#allocation6]   ;;  %s645_s8 = scalar_lea.hbm %s823_s5, 1024 }
  0x23   :  { %s49_s28 = sshll.u32 %s675_s26, 4  ;;  %p646_p2 = scmp.ne.s32.totalorder %s823_s5, %s645_s8  ;;  %s50_s28 = int_to_ptr.vmem [resolvable:$true] %s49_s28 }
  0x24   :  { %p649_p3 = scmp.lt.u32.totalorder %s645_s8, %s823_s5 }
  0x26   :  { %p651_p4 = pnand %p649_p3, %p646_p2 }
  0x28   :  { %654 = shalt.err (!%p651_p4)
}
  0x29   :  { %s655_s15 = scalar_lea.vmem %s50_s28, 1024  ;;  %p660_p6 = scmp.lt.s32.totalorder %s50_s28, %s50_s28 }
  0x2a   :  { %p656_p5 = scmp.ne.s32.totalorder %s50_s28, %s655_s15  ;;  %p661_p7 = scmp.lt.s32.totalorder %s655_s15, %s655_s15 }
  0x2c   :  { %p662_p8 = por %p661_p7, %p660_p6 }
  0x2e   :  { %p663_p9 = pnand %p662_p8, %p656_p5 }
  0x30   :  { %666 = shalt.err (!%p663_p9)
}
  0x31   :  { %55 = dma.hbm_to_vmem [thread:$0]  %s823_s5, 1024, %s50_s28, [#allocation5], %s673_s13, %s673_s13, %s674_s14  }
  0x32   :  { %667 = dma.done.wait [#allocation3], 1024  }
  0x33   :  { %668 = vsyncadd [#allocation3], 4294966272 }
  0x34   :  { %669 = dma.done.wait [#allocation5], 2048  }
  0x35   :  { %670 = vsyncadd [#allocation5], 4294965248  ;;  %v676_v0 = vmov 0.0   ;;  %vm677_vm0 = vmmov 0   ;;  %v568_v1 = vld [vmem:[#allocation2] sm:$0xff]   ;;  %v569_v2 = vld [vmem:[#allocation2 + $0x8] sm:$0xff]  }
  0x36   :  { %501 = vmatprep.subr.bf16.mxu0 %v676_v0  ;;  %517 = vmatprep.mubr.msk.bf16.mxu0 %vm677_vm0, %v676_v0  ;;  %v570_v3 = vld [vmem:[#allocation2 + $0x10] sm:$0xff]   ;;  %v577_v4 = vld [vmem:[#allocation4] sm:$0xff]   ;;  %v571_v5 = vld [vmem:[#allocation2 + $0x18] sm:$0xff]  }
  0x37   :  { %521 = vmatprep.subr.bf16.mxu1 %v676_v0  ;;  %537 = vmatprep.mubr.msk.bf16.mxu1 %vm677_vm0, %v676_v0  ;;  %v578_v6 = vld [vmem:[#allocation4 + $0x8] sm:$0xff]   ;;  %v572_v7 = vld [vmem:[#allocation2 + $0x20] sm:$0xff]   ;;  %v579_v8 = vld [vmem:[#allocation4 + $0x10] sm:$0xff]  }
  0x38   :  { %502 = vmatpush3.bf16.msra.mxu0 %v568_v1  ;;  %522 = vmatpush3.bf16.msra.mxu1 %v577_v4  ;;  %v573_v9 = vld [vmem:[#allocation2 + $0x28] sm:$0xff]   ;;  %v580_v10 = vld [vmem:[#allocation4 + $0x18] sm:$0xff]   ;;  %v574_v11 = vld [vmem:[#allocation2 + $0x30] sm:$0xff]  }
  0x39   :  { %503 = vmatprep.subr.bf16.mxu0 %v676_v0  ;;  %523 = vmatprep.subr.bf16.mxu1 %v676_v0  ;;  %v581_v12 = vld [vmem:[#allocation4 + $0x20] sm:$0xff]   ;;  %v575_v13 = vld [vmem:[#allocation2 + $0x38] sm:$0xff]   ;;  %v582_v14 = vld [vmem:[#allocation4 + $0x28] sm:$0xff]  }
  0x3a   :  { %v576_v15 = vld [vmem:[%s818_s0] sm:$0xff]   ;;  %v583_v16 = vld [vmem:[#allocation4 + $0x30] sm:$0xff]   ;;  %v584_v17 = vld [vmem:[#allocation4 + $0x38] sm:$0xff]  }
  0x3b   :  { %v585_v18 = vld [vmem:[#allocation6] sm:$0xff]   ;;  %v586_v19 = vld [vmem:[#allocation6 + $0x8] sm:$0xff]   ;;  %v587_v20 = vld [vmem:[#allocation6 + $0x10] sm:$0xff]  }
  0x3c   :  { %504 = vmatpush3.bf16.msra.mxu0 %v569_v2  ;;  %524 = vmatpush3.bf16.msra.mxu1 %v578_v6  ;;  %v588_v21 = vld [vmem:[#allocation6 + $0x18] sm:$0xff]   ;;  %v589_v22 = vld [vmem:[#allocation6 + $0x20] sm:$0xff]   ;;  %v590_v23 = vld [vmem:[#allocation6 + $0x28] sm:$0xff]  }
  0x3d   :  { %505 = vmatprep.subr.bf16.mxu0 %v676_v0  ;;  %525 = vmatprep.subr.bf16.mxu1 %v676_v0  ;;  %v446_v24 = vld [vmem:[%s820_s2] ss:$0 sm:$0xff]  ;;  %v591_v34 = vld [vmem:[#allocation6 + $0x30] sm:$0xff]   ;;  %v592_v35 = vld [vmem:[#allocation6 + $0x38] sm:$0xff]  }
  0x3e   :  { %v456_v36 = vld [vmem:[%s822_s4] ss:$0 sm:$0xff] }
  0x3f   :  { %v465_v46 = vld [vmem:[%s824_s6] ss:$0 sm:$0xff] }
  0x40   :  { %506 = vmatpush3.bf16.msra.mxu0 %v570_v3  ;;  %526 = vmatpush3.bf16.msra.mxu1 %v579_v8 }
  0x41   :  { %507 = vmatprep.subr.bf16.mxu0 %v676_v0  ;;  %527 = vmatprep.subr.bf16.mxu1 %v676_v0 }
  0x44   :  { %508 = vmatpush3.bf16.msra.mxu0 %v571_v5  ;;  %528 = vmatpush3.bf16.msra.mxu1 %v580_v10 }
  0x45   :  { %509 = vmatprep.subr.bf16.mxu0 %v676_v0  ;;  %529 = vmatprep.subr.bf16.mxu1 %v676_v0 }
  0x48   :  { %510 = vmatpush3.bf16.msra.mxu0 %v572_v7  ;;  %530 = vmatpush3.bf16.msra.mxu1 %v581_v12 }
  0x49   :  { %511 = vmatprep.subr.bf16.mxu0 %v676_v0  ;;  %531 = vmatprep.subr.bf16.mxu1 %v676_v0 }
  0x4c   :  { %512 = vmatpush3.bf16.msra.mxu0 %v573_v9  ;;  %532 = vmatpush3.bf16.msra.mxu1 %v582_v14 }
  0x4d   :  { %513 = vmatprep.subr.bf16.mxu0 %v676_v0  ;;  %533 = vmatprep.subr.bf16.mxu1 %v676_v0 }
  0x50   :  { %514 = vmatpush3.bf16.msra.mxu0 %v574_v11  ;;  %534 = vmatpush3.bf16.msra.mxu1 %v583_v16 }
  0x51   :  { %515 = vmatprep.subr.bf16.mxu0 %v676_v0  ;;  %535 = vmatprep.subr.bf16.mxu1 %v676_v0 }
  0x54   :  { %516 = vmatpush3.bf16.msra.mxu0 %v575_v13  ;;  %536 = vmatpush3.bf16.msra.mxu1 %v584_v17 }
  0x55   :  { %541 = vmatprep.subr.bf16.mxu0 %v676_v0 }
  0x57   :  { %518 = vmatmul.mubr.bf16.vlgmr.msra.gmra.mrb[0].mxu0 %v576_v15 }
  0x58   :  { %557 = vmatprep.mubr.msk.bf16.mxu0 %vm677_vm0, %v676_v0  ;;  %542 = vmatpush3.bf16.msra.mxu0 %v585_v18 }
  0x59   :  { %543 = vmatprep.subr.bf16.mxu0 %v676_v0 }
  0x5c   :  { %544 = vmatpush3.bf16.msra.mxu0 %v586_v19 }
  0x5d   :  { %545 = vmatprep.subr.bf16.mxu0 %v676_v0 }
  0x60   :  { %546 = vmatpush3.bf16.msra.mxu0 %v587_v20 }
  0x61   :  { %547 = vmatprep.subr.bf16.mxu0 %v676_v0 }
  0x64   :  { %548 = vmatpush3.bf16.msra.mxu0 %v588_v21 }
  0x65   :  { %549 = vmatprep.subr.bf16.mxu0 %v676_v0 }
  0x68   :  { %550 = vmatpush3.bf16.msra.mxu0 %v589_v22 }
  0x69   :  { %551 = vmatprep.subr.bf16.mxu0 %v676_v0 }
  0x6c   :  { %552 = vmatpush3.bf16.msra.mxu0 %v590_v23 }
  0x6d   :  { %553 = vmatprep.subr.bf16.mxu0 %v676_v0 }
  0x70   :  { %554 = vmatpush3.bf16.msra.mxu0 %v591_v34 }
  0x71   :  { %555 = vmatprep.subr.bf16.mxu0 %v676_v0 }
  0x74   :  { %556 = vmatpush3.bf16.msra.mxu0 %v592_v35 }
 0x12a   :  { %v181_v25 = vpop.f32.mrb[0].mxu0 }
 0x12b   :  { %v182_v26 = vadd.f32 %v446_v24, %v181_v25  ;;  %v519_v27 = vpop.f32.mrb[1].mxu0 }
 0x12c   :  { %v184_v28 = vpop.f32.mrb[2].mxu0 }
 0x12d   :  { %v185_v29 = vadd.f32 %v446_v24, %v184_v28  ;;  %v520_v30 = vpop.f32.mrb[3].mxu0  ;;  %v188_v31 = vmax.f32 %v182_v26, 0.0 }
 0x12f   :  { %v189_v32 = vmax.f32 %v185_v29, 0.0 }
 0x131   :  { %v190_v33 = vpack.c.bf16 %v189_v32, %v188_v31 }
 0x133   :  { %538 = vmatmul.mubr.bf16.vlgmr.msra.gmra.mrb[0].mxu1 %v190_v33 }
 0x206   :  { %v296_v37 = vpop.f32.mrb[0].mxu1 }
 0x207   :  { %v297_v38 = vadd.f32 %v456_v36, %v296_v37  ;;  %v539_v39 = vpop.f32.mrb[1].mxu1 }
 0x208   :  { %v299_v40 = vpop.f32.mrb[2].mxu1 }
 0x209   :  { %v300_v41 = vadd.f32 %v456_v36, %v299_v40  ;;  %v540_v42 = vpop.f32.mrb[3].mxu1  ;;  %v303_v43 = vmax.f32 %v297_v38, 0.0 }
 0x20b   :  { %v304_v44 = vmax.f32 %v300_v41, 0.0 }
 0x20d   :  { %v305_v45 = vpack.c.bf16 %v304_v44, %v303_v43 }
 0x20f   :  { %558 = vmatmul.mubr.bf16.vlgmr.msra.gmra.mrb[4].mxu0 %v305_v45 }
 0x2e2   :  { %v411_v47 = vpop.f32.mrb[4].mxu0 }
 0x2e3   :  { %v412_v48 = vadd.f32 %v465_v46, %v411_v47  ;;  %v559_v49 = vpop.f32.mrb[5].mxu0 }
 0x2e4   :  { %v414_v50 = vpop.f32.mrb[6].mxu0 }
 0x2e5   :  { %418 = vmax.xlane.f32.xlu0 %v412_v48  ;;  %v560_v51 = vpop.f32.mrb[7].mxu0  ;;  %v415_v52 = vadd.f32 %v465_v46, %v414_v50 }
 0x2e9   :  { %420 = vmax.xlane.f32.xlu0 %v415_v52 }
 0x372   :  { %v419_v53 = vpop.xlane.xlu0 %418 }
 0x373   :  { %v422_v54 = vsub.f32 %v412_v48, %v419_v53 }
 0x375   :  { %v424_v55 = vmul.f32 1.442695, %v422_v54 }
 0x376   :  { %v421_v56 = vpop.xlane.xlu0 %420 }
 0x377   :  { %v423_v57 = vsub.f32 %v415_v52, %v421_v56  ;;  %593 = vpow2.f32 %v424_v55 }
 0x379   :  { %v426_v58 = vmul.f32 1.442695, %v423_v57 }
 0x37b   :  { %595 = vpow2.f32 %v426_v58 }
 0x381   :  { %v594_v59 = vpop.eup %593 }
 0x382   :  { %428 = vadd.xlane.f32.xlu1 %v594_v59 }
 0x385   :  { %v596_v60 = vpop.eup %595 }
 0x386   :  { %430 = vadd.xlane.f32.xlu1 %v596_v60 }
 0x40f   :  { %v429_v61 = vpop.xlane.xlu1 %428 }
 0x410   :  { %597 = vlog2.f32 %v429_v61 }
 0x413   :  { %v431_v62 = vpop.xlane.xlu1 %430 }
 0x414   :  { %599 = vlog2.f32 %v431_v62 }
 0x41a   :  { %v598_v63 = vpop.eup %597 }
 0x41b   :  { %v433_v0 = vmul.f32 0.6931472, %v598_v63 }
 0x41d   :  { %v436_v1 = vsub.f32 %v422_v54, %v433_v0 }
 0x41e   :  { %v600_v2 = vpop.eup %599 }
 0x41f   :  { %438 = vst [vmem:[%s825_s7] sm:$0xff] %v436_v1  ;;  %v435_v3 = vmul.f32 0.6931472, %v600_v2 }
 0x421   :  { %v437_v4 = vsub.f32 %v423_v57, %v435_v3 }
 0x423   :  { %439 = vst [vmem:[%s825_s7 + $0x8] sm:$0xff] %v437_v4 }
 0x424   :  { %444 = vsyncpa [#allocation3], 1 }
 0x425   :  { %445 = vsyncpa [#allocation5], 1 }

</bundles_post_ra>
